<compile_context>
chip_gen: v7x
topology: tpu7x:2x2x1
jax: 0.10.0
libtpu: 0.0.40
codegen_flags: <defaults>
</compile_context>

<pallas_src>
import jax
import jax.numpy as jnp
from jax.experimental import pallas as pl
from jax.experimental.pallas import tpu as pltpu


def _round_up(a, m):
    return ((a + m - 1) // m) * m


def _cdiv(a, b):
    return (a + b - 1) // b


def predictor_kernel(x_ref, s_ref, b_ref, o_ref):
    # x_ref: (tm, Wp) VMEM, lane-dense packed rows (Wp = pack * D, usually 128)
    # s_ref: (pack, Wp) VMEM, block-diagonal weight kron(I_pack, w), f32
    # b_ref: (1, 1) SMEM scalar bias
    # o_ref: (pack, tm) VMEM, lane-dense output
    x = x_ref[...].astype(jnp.float32)
    s = s_ref[...]
    # Contract the lane dim of both operands on the (otherwise idle) MXU:
    # result[k, r] = dot(original_row(pack*r + k), w).  Row-independent, so
    # garbage rows in a clipped boundary block only affect clipped columns.
    acc = jax.lax.dot_general(
        s, x,
        dimension_numbers=(((1,), (1,)), ((), ())),
        preferred_element_type=jnp.float32,
    )  # (pack, tm)
    o_ref[...] = (acc + b_ref[0, 0]).astype(o_ref.dtype)


def predictor_forward(x, w, b, *, tm=None, target_block_bytes=4 * 1024 * 1024):
    """x: [..., D];  w: any shape with D elements (torch [1, D] ok);  b: [1].
    Returns [..., 1] == x @ W^T + b (nn.Linear semantics)."""
    D = x.shape[-1]
    lead = x.shape[:-1]
    x2d = x.reshape(-1, D)
    M = x2d.shape[0]

    # ---- pack several logical rows onto the 128 lanes (free reshape) ----
    pack = 128 // D if (D <= 128 and 128 % D == 0) else 1
    M_eff = _round_up(max(M, 1), pack)
    if M_eff != M:
        # Rare path: at most pack-1 (<= 3) rows of zero padding; only hit when the
        # flattened batch is not a multiple of `pack`.
        x2d = jnp.pad(x2d, ((0, M_eff - M), (0, 0)))
    Wp = pack * D
    xp = x2d.reshape(M_eff // pack, Wp)   # zero-copy when M % pack == 0
    Mr = M_eff // pack                    # packed row count

    # Block-diagonal weight (pack, Wp): row k holds w in lanes [k*D, (k+1)*D).
    w32 = w.reshape(1, D).astype(jnp.float32)
    s_t = jnp.kron(jnp.eye(pack, dtype=jnp.float32), w32)
    b_smem = b.reshape(1, 1).astype(jnp.float32)

    # ---- tile-size heuristic: ~4 MiB of x per grid step, lane-padding aware ----
    lanes = _round_up(Wp, 128)
    row_bytes = lanes * x2d.dtype.itemsize
    if tm is None:
        tm = max(128, (target_block_bytes // row_bytes) // 128 * 128)
        if Mr <= 1024:
            tm = Mr                                   # tiny problem: one grid step
        elif Mr < 2 * tm:
            tm = _round_up(_cdiv(Mr, 2), 128)         # >= 2 steps (v7x megacore)
    grid = (_cdiv(Mr, tm),)                           # partial last block allowed

    out_dtype = x.dtype
    # VMEM footprint: double-buffered x block + double-buffered out block + weight.
    vmem_need = (2 * tm * row_bytes
                 + 2 * 8 * _round_up(max(tm, 128), 128) * jnp.dtype(out_dtype).itemsize
                 + 2 * 8 * lanes * 4
                 + (1 << 20))
    vmem_limit = int(min(max(vmem_need, 16 * 1024 * 1024), 48 * 1024 * 1024))

    outp = pl.pallas_call(
        predictor_kernel,
        out_shape=jax.ShapeDtypeStruct((pack, Mr), out_dtype),
        grid=grid,
        in_specs=[
            pl.BlockSpec((tm, Wp), lambda i: (i, 0)),             # x row tile (pipelined)
            pl.BlockSpec((pack, Wp), lambda i: (0, 0)),           # weight, resident
            pl.BlockSpec(memory_space=pltpu.MemorySpace.SMEM),    # bias scalar in SMEM
        ],
        out_specs=pl.BlockSpec((pack, tm), lambda i: (0, i)),     # lane-dense output
        compiler_params=pltpu.CompilerParams(
            dimension_semantics=("parallel",),
            vmem_limit_bytes=vmem_limit,
        ),
        cost_estimate=pl.CostEstimate(
            flops=2 * Mr * Wp * pack,
            transcendentals=0,
            bytes_accessed=int(Mr * Wp * x2d.dtype.itemsize
                               + pack * Wp * 4
                               + pack * Mr * jnp.dtype(out_dtype).itemsize),
        ),
    )(xp, s_t, b_smem)

    # outp[k, r] = result for original row pack*r + k  ->  transpose of the tiny
    # output restores row order; final reshape is free.
    out_flat = outp.T.reshape(-1)[:M]
    return out_flat.reshape(*lead, 1)


if __name__ == "__main__":
    # Shapes implied by the module: dim_input=32, batch=2, seq=16.
    B, S, D = 2, 16, 32

    key = jax.random.PRNGKey(0)
    kx, kw, kb = jax.random.split(key, 3)

    x = jax.random.normal(kx, (B, S, D), dtype=jnp.float32)
    # nn.Linear(D, 1): weight [1, D] (torch layout), bias [1].
    w = jax.random.normal(kw, (1, D), dtype=jnp.float32) * (1.0 / jnp.sqrt(D))
    b = jax.random.normal(kb, (1,), dtype=jnp.float32) * 0.01

    out = jax.block_until_ready(predictor_forward(x, w, b))
    ref = x @ w.T + b
    assert out.shape == (B, S, 1)
    assert jnp.allclose(out, ref, atol=1e-4, rtol=1e-4)

    # Exercise the pack-remainder path: flattened rows not a multiple of 4.
    x_odd = jax.random.normal(kx, (3, 5, D), dtype=jnp.float32)
    out_odd = jax.block_until_ready(predictor_forward(x_odd, w, b))
    assert out_odd.shape == (3, 5, 1)
    assert jnp.allclose(out_odd, x_odd @ w.T + b, atol=1e-4, rtol=1e-4)

    # Exercise a multi-step grid with a partial (clipped) last block.
    x_big = jax.random.normal(kx, (8, 600, D), dtype=jnp.float32)
    out_big = jax.block_until_ready(predictor_forward(x_big, w, b))
    assert out_big.shape == (8, 600, 1)
    assert jnp.allclose(out_big, x_big @ w.T + b, atol=1e-4, rtol=1e-4)

    print("KERNEL_OK")
</pallas_src>

<mosaic_0001>
module attributes {stable_mosaic.version = 11 : i64} {
  func.func @predictor_kernel(%arg0: i32, %arg1: memref<8x128xf32, #tpu.memory_space<vmem>>, %arg2: memref<4x128xf32, #tpu.memory_space<vmem>>, %arg3: memref<1x1xf32, #tpu.memory_space<smem>>, %arg4: memref<4x8xf32, #tpu.memory_space<vmem>>) attributes {dimension_semantics = [#tpu.dimension_semantics<parallel>], iteration_bounds = array<i64: 1>, scalar_prefetch = 0 : i64, scratch_operands = 0 : i64, tpu.core_type = #tpu.core_type<tc>, window_params = [{transform_indices = @transform_0, window_bounds = array<i64: 8, 128>}, {pipeline_mode = #tpu.pipeline_mode<synchronous>, transform_indices = @transform_1, window_bounds = array<i64: 4, 128>}, {transform_indices = @transform_2, window_bounds = array<i64: 1, 1>}, {transform_indices = @transform_3, window_bounds = array<i64: 4, 8>}]} {
    %c0 = arith.constant 0 : index
    %c0_0 = arith.constant 0 : index
    %0 = vector.load %arg1[%c0, %c0_0] : memref<8x128xf32, #tpu.memory_space<vmem>>, vector<8x128xf32>
    %c0_1 = arith.constant 0 : index
    %c0_2 = arith.constant 0 : index
    %1 = vector.load %arg2[%c0_1, %c0_2] : memref<4x128xf32, #tpu.memory_space<vmem>>, vector<4x128xf32>
    %cst = arith.constant dense<0.000000e+00> : vector<4x8xf32>
    %2 = tpu.matmul %1, %0, %cst {dimension_numbers = #tpu.dot_dimension_numbers<[1], [1], [0], [0], [0, 0, 1, 0], [], []>} : vector<4x128xf32>, vector<8x128xf32>, vector<4x8xf32> -> vector<4x8xf32>
    %c0_3 = arith.constant 0 : index
    %c0_4 = arith.constant 0 : index
    %3 = memref.load %arg3[%c0_3, %c0_4] : memref<1x1xf32, #tpu.memory_space<smem>>
    %4 = vector.broadcast %3 : f32 to vector<4x8xf32>
    %5 = arith.addf %2, %4 : vector<4x8xf32>
    %c0_5 = arith.constant 0 : index
    %c0_6 = arith.constant 0 : index
    %6 = vector.load %arg4[%c0_5, %c0_6] : memref<4x8xf32, #tpu.memory_space<vmem>>, vector<4x8xf32>
    tpu.vector_store %arg4[%c0_5, %c0_6], %5 {strides = array<i32>} : memref<4x8xf32, #tpu.memory_space<vmem>>, vector<4x8xf32>,
    return
  }
  func.func @transform_0(%arg0: i32) -> (i32, i32) {
    %c0_i32 = arith.constant 0 : i32
    %c0_i32_0 = arith.constant 0 : i32
    return %arg0, %c0_i32 : i32, i32
  }
  func.func @transform_1(%arg0: i32) -> (i32, i32) {
    %c0_i32 = arith.constant 0 : i32
    %c0_i32_0 = arith.constant 0 : i32
    %c0_i32_1 = arith.constant 0 : i32
    return %c0_i32, %c0_i32_0 : i32, i32
  }
  func.func @transform_2(%arg0: i32) -> (i32, i32) {
    %c0_i32 = arith.constant 0 : i32
    %c0_i32_0 = arith.constant 0 : i32
    %c0_i32_1 = arith.constant 0 : i32
    return %c0_i32, %c0_i32_0 : i32, i32
  }
  func.func @transform_3(%arg0: i32) -> (i32, i32) {
    %c0_i32 = arith.constant 0 : i32
    %c0_i32_0 = arith.constant 0 : i32
    return %c0_i32, %arg0 : i32, i32
  }
}

</mosaic_0001>

<bundles_post_ra>
// kernel: tpu_custom_call.1
= control target key start
LH: loop header
LB: loop body
LE: loop exit
PB: predicated region body
PF: predicated region fallthrough
CT: control target
= control target key end

     0   :  { %9 = vsyncpa [#allocation4], 0  ;;  %s232_s0 = inlined_call_operand.hbm [shape: f32[8,128], index: 0, kind: input, shape index: {}]   ;;  %s233_s1 = inlined_call_operand.vmem [shape: f32[4,128], index: 1, kind: input, shape index: {}]   ;;  %s234_s2 = inlined_call_operand.<no memory space> [shape: f32[1,1], index: 2, kind: input, shape index: {}]   ;;  %s235_s3 = inlined_call_operand.hbm [shape: f32[4,8], index: 3, kind: output, shape index: {}]  }
   0x1   :  { %10 = vsyncpa [#allocation5], 0  ;;  %s178_s12 = smov [#allocation3]   ;;  %s130_s16 = scalar_lea.hbm %s232_s0, 128 }
   0x2   :  { %s17_s13 = sshll.u32 %s178_s12, 4  ;;  %p131_p0 = scmp.ne.s32.totalorder %s232_s0, %s130_s16  ;;  %s18_s13 = int_to_ptr.vmem [resolvable:$true] %s17_s13 }
   0x3   :  { %p134_p1 = scmp.lt.u32.totalorder %s130_s16, %s232_s0 }
   0x5   :  { %p136_p2 = pnand %p134_p1, %p131_p0 }
   0x7   :  { %139 = shalt.err (!%p136_p2)
}
   0x8   :  { %s140_s21 = scalar_lea.vmem %s18_s13, 128  ;;  %p145_p4 = scmp.lt.s32.totalorder %s18_s13, %s18_s13 }
   0x9   :  { %p141_p3 = scmp.ne.s32.totalorder %s18_s13, %s140_s21  ;;  %p146_p5 = scmp.lt.s32.totalorder %s140_s21, %s140_s21 }
   0xb   :  { %p147_p6 = por %p146_p5, %p145_p4 }
   0xd   :  { %p148_p7 = pnand %p147_p6, %p141_p3 }
   0xf   :  { %151 = shalt.err (!%p148_p7)
}
  0x10   :  { %20 = dma.hbm_to_vmem [thread:$0]  %s232_s0, 128, %s18_s13, [#allocation4]  }
  0x11   :  { %174 = dma.done.wait [#allocation4], 128  }
  0x12   :  { %175 = vsyncadd [#allocation4], 4294967168  ;;  %v179_v0 = vmov 0.0   ;;  %vm180_vm0 = vmmov 0   ;;  %v28_v1 = vld [vmem:[#allocation3] sm:$0xff]  ;;  %v31_v3 = vstv %s234_s2  ;;  %s181_s28 = smov [#allocation6]  }
  0x13   :  { %121 = vmatprep.subr.mxu0 %v179_v0  ;;  %123 = vmatprep.mubr.msk.f32.mxu0 %vm180_vm0, %v179_v0  ;;  %v29_v2 = vld [vmem:[%s233_s1] sm:$0xf]  ;;  %s110_s29 = sshll.u32 %s181_s28, 4  ;;  %vm102_vm1 = vcmask 60416   ;;  %s111_s29 = int_to_ptr.vmem [resolvable:$true] %s110_s29 }
  0x14   :  { %122 = vmatpush3.xpose.msra.mxu0 %v28_v1  ;;  %s152_s0 = scalar_lea.vmem %s111_s29, 64  ;;  %p157_p9 = scmp.lt.s32.totalorder %s111_s29, %s111_s29 }
  0x15   :  { %p153_p8 = scmp.ne.s32.totalorder %s111_s29, %s152_s0  ;;  %p158_p10 = scmp.lt.s32.totalorder %s152_s0, %s152_s0 }
  0x17   :  { %124 = vmatmul.mubr.f32.vlgmr.msra.gmra.mrb[0].mxu0 %v29_v2  ;;  %p159_p11 = por %p158_p10, %p157_p9 }
  0x19   :  { %p160_p12 = pnand %p159_p11, %p153_p8 }
  0xea   :  { %v98_v4 = vpop.f32.mrb[0].mxu0 }
  0xeb   :  { %v99_v5 = vadd.f32 %v98_v4, %v31_v3  ;;  %v125_v6 = vpop.f32.mrb[1].mxu0 }
  0xed   :  { %103 = vst.msk [vmem:[#allocation6] sm:$0xf] %vm102_vm1, %v99_v5 }
  0xee   :  { %163 = shalt.err (!%p160_p12)
}
  0xef   :  { %s164_s4 = scalar_lea.hbm %s235_s3, 64 }
  0xf0   :  { %p165_p13 = scmp.ne.s32.totalorder %s235_s3, %s164_s4  ;;  %p168_p0 = scmp.lt.u32.totalorder %s164_s4, %s235_s3 }
  0xf2   :  { %p170_p1 = pnand %p168_p0, %p165_p13 }
  0xf4   :  { %173 = shalt.err (!%p170_p1)
}
  0xf5   :  { %113 = dma.vmem_to_hbm [thread:$0]  %s111_s29, 64, %s235_s3, [#allocation5]  }
  0xf6   :  { %176 = dma.done.wait [#allocation5], 64  }
  0xf7   :  { %177 = vsyncadd [#allocation5], 4294967232 }
  0xf8   :  { %117 = vsyncpa [#allocation4], 1 }
  0xf9   :  { %118 = vsyncpa [#allocation5], 1 }

</bundles_post_ra>
